<compile_context>
chip_gen: v6e
topology: v6e:2x2x1
jax: 0.10.0
libtpu: 0.0.40
codegen_flags: <defaults>
</compile_context>

<pallas_src>
import jax
import jax.numpy as jnp
from jax import lax
from jax.experimental import pallas as pl
from jax.experimental.pallas import tpu as pltpu

_SUBLANE = 8                      # second-to-last-dim tiling unit
_TB_MAX = 8192                    # max batch rows per grid step
_MEGACORE_MIN = 1024              # above this, force >=2 grid steps (v7x megacore)
_VMEM_LIMIT = 32 * 1024 * 1024    # covers 2x double-buffered 8192-row tiles (+headroom)


def _round_up(v, m):
    return ((v + m - 1) // m) * m


def _choose_batch_tiling(batch):
    """Trace-time choice of (tile_rows, padded_batch).

    Near-even split into ceil(B8/_TB_MAX) tiles (>=2 tiles for large batches so
    v7x megacore sharding has work), sublane-aligned, with <= 8*nsteps rows of
    padding waste.
    """
    b_pad8 = _round_up(batch, _SUBLANE)
    nsteps = -(-b_pad8 // _TB_MAX)          # ceil
    if nsteps == 1 and b_pad8 >= _MEGACORE_MIN:
        nsteps = 2                          # keep megacore busy on v7x
    tb = _round_up(-(-b_pad8 // nsteps), _SUBLANE)
    b_pad = _round_up(b_pad8, tb)
    return tb, b_pad


def _dqn_kernel(x_ref, w1_ref, b1_ref, w2_ref, b2_ref, w3_ref, b3_ref, o_ref):
    """Fused forward for one batch tile: relu(x@W1+b1) -> relu(@W2+b2) -> @W3+b3."""
    prec = lax.Precision.HIGHEST  # true f32 matmul (matches PyTorch f32 semantics)
    x = x_ref[...]
    h1 = jnp.dot(x, w1_ref[...], preferred_element_type=jnp.float32,
                 precision=prec) + b1_ref[...]
    h1 = jnp.maximum(h1, 0.0)
    h2 = jnp.dot(h1, w2_ref[...], preferred_element_type=jnp.float32,
                 precision=prec) + b2_ref[...]
    h2 = jnp.maximum(h2, 0.0)
    out = jnp.dot(h2, w3_ref[...], preferred_element_type=jnp.float32,
                  precision=prec) + b3_ref[...]
    o_ref[...] = out.astype(o_ref.dtype)


@jax.jit
def dqn_forward(x, params):
    """Q-values for a batch of observations.

    x:       [B, n_obs] float32
    params:  w1 [n_obs,32], b1 [1,32], w2 [32,32], b2 [1,32],
             w3 [32,n_actions], b3 [1,n_actions]
    returns: [B, n_actions] float32
    """
    B, n_obs = x.shape
    n_actions = params["w3"].shape[1]

    tb, b_pad = _choose_batch_tiling(B)
    # Only pad the batch if needed (common aligned small batches: no extra ops).
    x_p = jnp.pad(x, ((0, b_pad - B), (0, 0))) if b_pad != B else x
    grid = (b_pad // tb,)

    out_p = pl.pallas_call(
        _dqn_kernel,
        out_shape=jax.ShapeDtypeStruct((b_pad, n_actions), jnp.float32),
        grid=grid,
        in_specs=[
            # x: pipelined over batch tiles.
            pl.BlockSpec((tb, n_obs), lambda i: (i, 0)),
            # weights/biases: same block every grid step -> stay VMEM-resident.
            pl.BlockSpec(params["w1"].shape, lambda i: (0, 0)),
            pl.BlockSpec(params["b1"].shape, lambda i: (0, 0)),
            pl.BlockSpec(params["w2"].shape, lambda i: (0, 0)),
            pl.BlockSpec(params["b2"].shape, lambda i: (0, 0)),
            pl.BlockSpec(params["w3"].shape, lambda i: (0, 0)),
            pl.BlockSpec(params["b3"].shape, lambda i: (0, 0)),
        ],
        # Unpadded output: last dim equals the full array dim (legal BlockSpec);
        # avoids 128-lane write inflation and the post-kernel column slice.
        out_specs=pl.BlockSpec((tb, n_actions), lambda i: (i, 0)),
        compiler_params=pltpu.CompilerParams(
            dimension_semantics=("parallel",),   # megacore on v7x; no-op on v5e/v6e
            vmem_limit_bytes=_VMEM_LIMIT,
        ),
    )(x_p, params["w1"], params["b1"], params["w2"], params["b2"],
      params["w3"], params["b3"])

    return out_p if b_pad == B else out_p[:B]


def init_dqn_params(key, n_obs, n_actions, hidden=32):
    """Deterministic init mirroring nn.Linear's U(-1/sqrt(fan_in), 1/sqrt(fan_in)).

    Weights stored as [in_features, out_features] (transposed from PyTorch's
    [out, in]) so the kernel computes x @ W + b directly; biases as [1, out].
    """
    def linear(k, fan_in, fan_out):
        kw, kb = jax.random.split(k)
        bound = 1.0 / jnp.sqrt(jnp.float32(fan_in))
        w = jax.random.uniform(kw, (fan_in, fan_out), jnp.float32, -bound, bound)
        b = jax.random.uniform(kb, (1, fan_out), jnp.float32, -bound, bound)
        return w, b

    k1, k2, k3 = jax.random.split(key, 3)
    w1, b1 = linear(k1, n_obs, hidden)
    w2, b2 = linear(k2, hidden, hidden)
    w3, b3 = linear(k3, hidden, n_actions)
    return {"w1": w1, "b1": b1, "w2": w2, "b2": b2, "w3": w3, "b3": b3}


def dqn_reference(x, p):
    """Plain-JAX reference (full f32 matmul precision) for correctness checking."""
    prec = lax.Precision.HIGHEST
    h = jnp.maximum(jnp.dot(x, p["w1"], precision=prec) + p["b1"], 0.0)
    h = jnp.maximum(jnp.dot(h, p["w2"], precision=prec) + p["b2"], 0.0)
    return jnp.dot(h, p["w3"], precision=prec) + p["b3"]


if __name__ == "__main__":
    key = jax.random.PRNGKey(0)
    k_param, k_x1, k_x2, k_x3 = jax.random.split(key, 4)

    n_obs, n_actions = 8, 4
    params = init_dqn_params(k_param, n_obs, n_actions)

    # Small, sublane-aligned batch (typical RL action-selection shape):
    # single tile, no pad/slice ops around the kernel.
    x1 = jax.random.normal(k_x1, (8, n_obs), jnp.float32)
    q1 = jax.block_until_ready(dqn_forward(x1, params))
    assert q1.shape == (8, n_actions)
    assert jnp.allclose(q1, dqn_reference(x1, params), atol=1e-4, rtol=1e-4)

    # Batch not a multiple of 8: exercises the pad + row-slice path.
    x2 = jax.random.normal(k_x2, (20, n_obs), jnp.float32)
    q2 = jax.block_until_ready(dqn_forward(x2, params))
    assert q2.shape == (20, n_actions)
    assert jnp.allclose(q2, dqn_reference(x2, params), atol=1e-4, rtol=1e-4)

    # Larger batch: exercises the multi-step grid (>=2 tiles, megacore on v7x).
    x3 = jax.random.normal(k_x3, (2100, n_obs), jnp.float32)
    q3 = jax.block_until_ready(dqn_forward(x3, params))
    assert q3.shape == (2100, n_actions)
    assert jnp.allclose(q3, dqn_reference(x3, params), atol=1e-4, rtol=1e-4)

    print("KERNEL_OK")
</pallas_src>

<mosaic_0001>
module attributes {stable_mosaic.version = 11 : i64} {
  func.func @_dqn_kernel(%arg0: i32, %arg1: memref<8x8xf32, #tpu.memory_space<vmem>>, %arg2: memref<8x32xf32, #tpu.memory_space<vmem>>, %arg3: memref<1x32xf32, #tpu.memory_space<vmem>>, %arg4: memref<32x32xf32, #tpu.memory_space<vmem>>, %arg5: memref<1x32xf32, #tpu.memory_space<vmem>>, %arg6: memref<32x4xf32, #tpu.memory_space<vmem>>, %arg7: memref<1x4xf32, #tpu.memory_space<vmem>>, %arg8: memref<8x4xf32, #tpu.memory_space<vmem>>) attributes {dimension_semantics = [#tpu.dimension_semantics<parallel>], iteration_bounds = array<i64: 1>, scalar_prefetch = 0 : i64, scratch_operands = 0 : i64, tpu.core_type = #tpu.core_type<tc>, window_params = [{transform_indices = @transform_0, window_bounds = array<i64: 8, 8>}, {pipeline_mode = #tpu.pipeline_mode<synchronous>, transform_indices = @transform_1, window_bounds = array<i64: 8, 32>}, {pipeline_mode = #tpu.pipeline_mode<synchronous>, transform_indices = @transform_2, window_bounds = array<i64: 1, 32>}, {pipeline_mode = #tpu.pipeline_mode<synchronous>, transform_indices = @transform_3, window_bounds = array<i64: 32, 32>}, {pipeline_mode = #tpu.pipeline_mode<synchronous>, transform_indices = @transform_4, window_bounds = array<i64: 1, 32>}, {pipeline_mode = #tpu.pipeline_mode<synchronous>, transform_indices = @transform_5, window_bounds = array<i64: 32, 4>}, {pipeline_mode = #tpu.pipeline_mode<synchronous>, transform_indices = @transform_6, window_bounds = array<i64: 1, 4>}, {transform_indices = @transform_7, window_bounds = array<i64: 8, 4>}]} {
    %c0 = arith.constant 0 : index
    %c0_0 = arith.constant 0 : index
    %0 = vector.load %arg1[%c0, %c0_0] : memref<8x8xf32, #tpu.memory_space<vmem>>, vector<8x8xf32>
    %c0_1 = arith.constant 0 : index
    %c0_2 = arith.constant 0 : index
    %1 = vector.load %arg2[%c0_1, %c0_2] : memref<8x32xf32, #tpu.memory_space<vmem>>, vector<8x32xf32>
    %cst = arith.constant dense<0.000000e+00> : vector<8x32xf32>
    %2 = tpu.matmul %0, %1, %cst {dimension_numbers = #tpu.dot_dimension_numbers<[1], [0], [0], [1], [0, 0, 1, 1], [], []>, precision = #tpu.contract_precision<fp32>} : vector<8x8xf32>, vector<8x32xf32>, vector<8x32xf32> -> vector<8x32xf32>
    %c0_3 = arith.constant 0 : index
    %c0_4 = arith.constant 0 : index
    %3 = vector.load %arg3[%c0_3, %c0_4] : memref<1x32xf32, #tpu.memory_space<vmem>>, vector<1x32xf32>
    %4 = vector.broadcast %3 : vector<1x32xf32> to vector<8x32xf32>
    %5 = arith.addf %2, %4 : vector<8x32xf32>
    %cst_5 = arith.constant 0.000000e+00 : f32
    %6 = vector.broadcast %cst_5 : f32 to vector<8x32xf32>
    %7 = arith.maximumf %5, %6 : vector<8x32xf32>
    %c0_6 = arith.constant 0 : index
    %c0_7 = arith.constant 0 : index
    %8 = vector.load %arg4[%c0_6, %c0_7] : memref<32x32xf32, #tpu.memory_space<vmem>>, vector<32x32xf32>
    %cst_8 = arith.constant dense<0.000000e+00> : vector<8x32xf32>
    %9 = tpu.matmul %7, %8, %cst_8 {dimension_numbers = #tpu.dot_dimension_numbers<[1], [0], [0], [1], [0, 0, 1, 1], [], []>, precision = #tpu.contract_precision<fp32>} : vector<8x32xf32>, vector<32x32xf32>, vector<8x32xf32> -> vector<8x32xf32>
    %c0_9 = arith.constant 0 : index
    %c0_10 = arith.constant 0 : index
    %10 = vector.load %arg5[%c0_9, %c0_10] : memref<1x32xf32, #tpu.memory_space<vmem>>, vector<1x32xf32>
    %11 = vector.broadcast %10 : vector<1x32xf32> to vector<8x32xf32>
    %12 = arith.addf %9, %11 : vector<8x32xf32>
    %cst_11 = arith.constant 0.000000e+00 : f32
    %13 = vector.broadcast %cst_11 : f32 to vector<8x32xf32>
    %14 = arith.maximumf %12, %13 : vector<8x32xf32>
    %c0_12 = arith.constant 0 : index
    %c0_13 = arith.constant 0 : index
    %15 = vector.load %arg6[%c0_12, %c0_13] : memref<32x4xf32, #tpu.memory_space<vmem>>, vector<32x4xf32>
    %cst_14 = arith.constant dense<0.000000e+00> : vector<8x4xf32>
    %16 = tpu.matmul %14, %15, %cst_14 {dimension_numbers = #tpu.dot_dimension_numbers<[1], [0], [0], [1], [0, 0, 1, 1], [], []>, precision = #tpu.contract_precision<fp32>} : vector<8x32xf32>, vector<32x4xf32>, vector<8x4xf32> -> vector<8x4xf32>
    %c0_15 = arith.constant 0 : index
    %c0_16 = arith.constant 0 : index
    %17 = vector.load %arg7[%c0_15, %c0_16] : memref<1x4xf32, #tpu.memory_space<vmem>>, vector<1x4xf32>
    %18 = vector.broadcast %17 : vector<1x4xf32> to vector<8x4xf32>
    %19 = arith.addf %16, %18 : vector<8x4xf32>
    %c0_17 = arith.constant 0 : index
    %c0_18 = arith.constant 0 : index
    %20 = vector.load %arg8[%c0_17, %c0_18] : memref<8x4xf32, #tpu.memory_space<vmem>>, vector<8x4xf32>
    tpu.vector_store %arg8[%c0_17, %c0_18], %19 {strides = array<i32>} : memref<8x4xf32, #tpu.memory_space<vmem>>, vector<8x4xf32>,
    return
  }
  func.func @transform_0(%arg0: i32) -> (i32, i32) {
    %c0_i32 = arith.constant 0 : i32
    %c0_i32_0 = arith.constant 0 : i32
    return %arg0, %c0_i32 : i32, i32
  }
  func.func @transform_1(%arg0: i32) -> (i32, i32) {
    %c0_i32 = arith.constant 0 : i32
    %c0_i32_0 = arith.constant 0 : i32
    %c0_i32_1 = arith.constant 0 : i32
    return %c0_i32, %c0_i32_0 : i32, i32
  }
  func.func @transform_2(%arg0: i32) -> (i32, i32) {
    %c0_i32 = arith.constant 0 : i32
    %c0_i32_0 = arith.constant 0 : i32
    %c0_i32_1 = arith.constant 0 : i32
    return %c0_i32, %c0_i32_0 : i32, i32
  }
  func.func @transform_3(%arg0: i32) -> (i32, i32) {
    %c0_i32 = arith.constant 0 : i32
    %c0_i32_0 = arith.constant 0 : i32
    %c0_i32_1 = arith.constant 0 : i32
    return %c0_i32, %c0_i32_0 : i32, i32
  }
  func.func @transform_4(%arg0: i32) -> (i32, i32) {
    %c0_i32 = arith.constant 0 : i32
    %c0_i32_0 = arith.constant 0 : i32
    %c0_i32_1 = arith.constant 0 : i32
    return %c0_i32, %c0_i32_0 : i32, i32
  }
  func.func @transform_5(%arg0: i32) -> (i32, i32) {
    %c0_i32 = arith.constant 0 : i32
    %c0_i32_0 = arith.constant 0 : i32
    %c0_i32_1 = arith.constant 0 : i32
    return %c0_i32, %c0_i32_0 : i32, i32
  }
  func.func @transform_6(%arg0: i32) -> (i32, i32) {
    %c0_i32 = arith.constant 0 : i32
    %c0_i32_0 = arith.constant 0 : i32
    %c0_i32_1 = arith.constant 0 : i32
    return %c0_i32, %c0_i32_0 : i32, i32
  }
  func.func @transform_7(%arg0: i32) -> (i32, i32) {
    %c0_i32 = arith.constant 0 : i32
    %c0_i32_0 = arith.constant 0 : i32
    return %arg0, %c0_i32 : i32, i32
  }
}

</mosaic_0001>

<bundles_post_ra>
// kernel: dqn_forward.1
= control target key start
LH: loop header
LB: loop body
LE: loop exit
PB: predicated region body
PF: predicated region fallthrough
CT: control target
= control target key end

     0   :  { %12 = vsyncpa [#allocation3], 0  ;;  %s2101_s0 = inlined_call_operand.vmem [shape: f32[8,8], index: 0, kind: input, shape index: {}]   ;;  %s2102_s1 = inlined_call_operand.hbm [shape: f32[8,32], index: 1, kind: input, shape index: {}]   ;;  %s2103_s2 = inlined_call_operand.vmem [shape: f32[1,32], index: 2, kind: input, shape index: {}]   ;;  %s2104_s3 = inlined_call_operand.vmem [shape: f32[32,32], index: 3, kind: input, shape index: {}]   ;;  %s2105_s4 = inlined_call_operand.vmem [shape: f32[1,32], index: 4, kind: input, shape index: {}]   ;;  %s2106_s5 = inlined_call_operand.vmem [shape: f32[32,4], index: 5, kind: input, shape index: {}]   ;;  %s2107_s6 = inlined_call_operand.hbm [shape: f32[1,4], index: 6, kind: input, shape index: {}]   ;;  %s2108_s7 = inlined_call_operand.vmem [shape: f32[8,4], index: 7, kind: output, shape index: {}]  }
   0x1   :  { %13 = vsyncpa [#allocation5], 0  ;;  %s1803_s24 = smov [#allocation2]   ;;  %s1804_s26 = smov [#allocation4]  }
   0x2   :  { %s22_s25 = sshll.u32 %s1803_s24, 4  ;;  %s40_s27 = sshll.u32 %s1804_s26, 4  ;;  %s23_s25 = int_to_ptr.vmem [resolvable:$true] %s22_s25  ;;  %s41_s27 = int_to_ptr.vmem [resolvable:$true] %s40_s27 }
   0x3   :  { %s1767_s28 = scalar_lea.vmem %s23_s25, 128  ;;  %p1772_p1 = scmp.lt.s32.totalorder %s23_s25, %s23_s25 }
   0x4   :  { %p1768_p0 = scmp.ne.s32.totalorder %s23_s25, %s1767_s28  ;;  %p1773_p2 = scmp.lt.s32.totalorder %s1767_s28, %s1767_s28 }
   0x6   :  { %p1774_p3 = por %p1773_p2, %p1772_p1 }
   0x8   :  { %p1775_p4 = pnand %p1774_p3, %p1768_p0 }
   0xa   :  { %1778 = shalt.err (!%p1775_p4)
}
   0xb   :  { %25 = dma.hbm_to_vmem [thread:$0]  %s2102_s1, 128, %s23_s25, [#allocation3]  }
   0xc   :  { %s1787_s8 = scalar_lea.vmem %s41_s27, 16  ;;  %s1791_s9 = scalar_lea.vmem %s41_s27, 32 }
   0xd   :  { %p1788_p5 = scmp.ne.s32.totalorder %s41_s27, %s1787_s8  ;;  %p1792_p6 = scmp.lt.s32.totalorder %s41_s27, %s41_s27 }
   0xe   :  { %p1793_p7 = scmp.lt.s32.totalorder %s1791_s9, %s1787_s8 }
  0x10   :  { %p1794_p8 = por %p1793_p7, %p1792_p6 }
  0x12   :  { %p1795_p9 = pnand %p1794_p8, %p1788_p5 }
  0x14   :  { %1798 = shalt.err (!%p1795_p9)
}
  0x15   :  { %43 = dma.hbm_to_vmem [thread:$0]  %s2107_s6, 16, %s41_s27, [#allocation5]  }
  0x16   :  { %1799 = dma.done.wait [#allocation3], 128  }
  0x17   :  { %1800 = vsyncadd [#allocation3], 4294967168 }
  0x18   :  { %1801 = dma.done.wait [#allocation5], 16  }
  0x19   :  { %1802 = vsyncadd [#allocation5], 4294967280  ;;  %v1805_v0 = vmov 0.0   ;;  %vm1806_vm0 = vmmov 0   ;;  %vm59_vm1 = vcmask 64512   ;;  %v51_v1 = vld [vmem:[#allocation2] sm:$0xff] }
  0x1a   :  { %1593 = vmatprep.subr.mxu0 %v1805_v0  ;;  %1598 = vmatprep.subr.mxu1 %v1805_v0  ;;  %v50_v2 = vld [vmem:[%s2101_s0] sm:$0xff]  ;;  %v94_v3 = vand.u32 4294901760, %v51_v1  ;;  %v513_v14 = vld [vmem:[%s2104_s3 + $0x18] sm:$0xff]  ;;  %v512_v16 = vld [vmem:[%s2104_s3 + $0x10] sm:$0xff]  ;;  %vm521_vm2 = vcmask 261120   ;;  %vm1510_vm3 = vcmask 31744  }
  0x1b   :  { %1595 = vmatprep.mubr.msk.f32.mxu0 %vm1806_vm0, %v1805_v0  ;;  %1600 = vmatprep.mubr.msk.f32.mxu1 %vm1806_vm0, %v1805_v0  ;;  %v61_v4 = vsel %vm59_vm1, %v50_v2, 0  ;;  %v1883_v15 = vand.u32 4294901760, %v513_v14  ;;  %v1891_v18 = vand.u32 4294901760, %v512_v16  ;;  %v511_v19 = vld [vmem:[%s2104_s3 + $0x8] sm:$0xff]  ;;  %v510_v23 = vld [vmem:[%s2104_s3] sm:$0xff] }
  0x1c   :  { %v129_v5 = vand.u32 4294901760, %v61_v4  ;;  %1594 = vmatpush3.msra.mxu0 %v94_v3  ;;  %v171_v6 = vsub.f32 %v51_v1, %v94_v3  ;;  %v1902_v22 = vand.u32 4294901760, %v511_v19  ;;  %v1916_v27 = vand.u32 4294901760, %v510_v23  ;;  %v1518_v38 = vld [vmem:[%s2103_s2] ss:$0 sm:$0xff]  ;;  %v1014_v1 = vld [vmem:[%s2106_s5 + $0x18] sm:$0xff] }
  0x1d   :  { %1603 = vmatprep.subr.mxu0 %v1805_v0  ;;  %v1889_v17 = vsub.f32 %v513_v14, %v1883_v15  ;;  %v1900_v21 = vsub.f32 %v512_v16, %v1891_v18  ;;  %v1995_v2 = vand.u32 4294901760, %v1014_v1 }
  0x1e   :  { %v130_v7 = vsub.f32 %v61_v4, %v129_v5  ;;  %v172_v8 = vand.u32 4294901760, %v171_v6  ;;  %v1914_v26 = vsub.f32 %v511_v19, %v1902_v22  ;;  %v1925_v31 = vsub.f32 %v510_v23, %v1916_v27 }
  0x1f   :  { %v631_v20 = vand.u32 4294901760, %v1889_v17  ;;  %v638_v25 = vand.u32 4294901760, %v1900_v21  ;;  %v2001_v4 = vsub.f32 %v1014_v1, %v1995_v2 }
  0x20   :  { %v131_v9 = vand.u32 4294901760, %v130_v7  ;;  %v173_v10 = vsub.f32 %v171_v6, %v172_v8  ;;  %v645_v30 = vand.u32 4294901760, %v1914_v26  ;;  %v652_v34 = vand.u32 4294901760, %v1925_v31 }
  0x21   :  { %v632_v24 = vsub.f32 %v1889_v17, %v631_v20  ;;  %v639_v29 = vsub.f32 %v1900_v21, %v638_v25 }
  0x22   :  { %v132_v11 = vsub.f32 %v130_v7, %v131_v9  ;;  %v174_v12 = vand.u32 4294901760, %v173_v10  ;;  %v646_v33 = vsub.f32 %v1914_v26, %v645_v30  ;;  %v653_v36 = vsub.f32 %v1925_v31, %v652_v34  ;;  %v1011_v10 = vld [vmem:[%s2106_s5] sm:$0xff] }
  0x23   :  { %v633_v28 = vand.u32 4294901760, %v632_v24  ;;  %v640_v32 = vand.u32 4294901760, %v639_v29  ;;  %v2028_v14 = vand.u32 4294901760, %v1011_v10 }
  0x24   :  { %v133_v13 = vand.u32 4294901760, %v132_v11  ;;  %1599 = vmatpush3.msra.mxu1 %v174_v12  ;;  %v647_v35 = vand.u32 4294901760, %v646_v33  ;;  %v654_v37 = vand.u32 4294901760, %v653_v36 }
  0x25   :  { %1601 = vmatmul.mubr.f32.vlgmr.msra.gmra.mxu1 %v129_v5  ;;  %1608 = vmatprep.subr.mxu1 %v1805_v0 }
  0x26   :  { %1596 = vmatmul.mubr.f32.vlgmr.msra.gmra.mxu0 %v133_v13  ;;  %1609 = vmatpush3.msra.mxu1 %v94_v3 }
  0x27   :  { %1604 = vmatpush3.msra.mxu0 %v171_v6  ;;  %1605 = vmatprep.mubr.msk.f32.mxu0 %vm1806_vm0, %v1805_v0  ;;  %v1012_v6 = vld [vmem:[%s2106_s5 + $0x8] sm:$0xff] }
  0x28   :  { %1610 = vmatprep.mubr.msk.f32.mxu1 %vm1806_vm0, %v1805_v0  ;;  %1613 = vmatprep.subr.mxu0 %v1805_v0 }
  0x29   :  { %1611 = vmatmul.mubr.f32.vlgmr.msra.gmra.mxu1 %v131_v9  ;;  %1618 = vmatprep.subr.mxu1 %v1805_v0  ;;  %v2014_v9 = vand.u32 4294901760, %v1012_v6 }
  0x2a   :  { %1606 = vmatmul.mubr.f32.vlgmr.msra.gmra.mxu0 %v130_v7  ;;  %1619 = vmatpush3.msra.mxu1 %v94_v3  ;;  %v1013_v3 = vld [vmem:[%s2106_s5 + $0x10] sm:$0xff]  ;;  %v1131_v7 = vand.u32 4294901760, %v2001_v4 }
  0x2b   :  { %1614 = vmatpush3.msra.mxu0 %v172_v8  ;;  %1615 = vmatprep.mubr.msk.f32.mxu0 %vm1806_vm0, %v1805_v0  ;;  %v2026_v13 = vsub.f32 %v1012_v6, %v2014_v9 }
  0x2c   :  { %1620 = vmatprep.mubr.msk.f32.mxu1 %vm1806_vm0, %v1805_v0  ;;  %1634 = vmatprep.subr.mxu1 %v1805_v0  ;;  %v1132_v11 = vsub.f32 %v2001_v4, %v1131_v7 }
  0x2d   :  { %1621 = vmatmul.mubr.f32.vlgmr.msra.gmra.mxu1 %v129_v5  ;;  %1623 = vmatprep.subr.mxu0 %v1805_v0 }
  0x2e   :  { %1616 = vmatmul.mubr.f32.vlgmr.msra.gmra.mxu0 %v129_v5  ;;  %1642 = vmatprep.mubr.msk.f32.mxu1 %vm1806_vm0, %v1805_v0  ;;  %v2003_v5 = vand.u32 4294901760, %v1013_v3 }
  0x2f   :  { %1631 = vmatprep.mubr.msk.f32.mxu0 %vm1806_vm0, %v1805_v0  ;;  %1624 = vmatpush3.msra.mxu0 %v1883_v15 }
  0x30   :  { %1625 = vmatprep.subr.mxu0 %v1805_v0  ;;  %1635 = vmatpush3.msra.mxu1 %v633_v28  ;;  %v2012_v8 = vsub.f32 %v1013_v3, %v2003_v5 }
  0x31   :  { %1626 = vmatpush3.msra.mxu0 %v1891_v18  ;;  %1636 = vmatprep.subr.mxu1 %v1805_v0 }
  0x32   :  { %1627 = vmatprep.subr.mxu0 %v1805_v0  ;;  %1637 = vmatpush3.msra.mxu1 %v640_v32  ;;  %v1138_v12 = vand.u32 4294901760, %v2012_v8 }
  0x33   :  { %1628 = vmatpush3.msra.mxu0 %v1902_v22  ;;  %1638 = vmatprep.subr.mxu1 %v1805_v0 }
  0x34   :  { %1629 = vmatprep.subr.mxu0 %v1805_v0  ;;  %1639 = vmatpush3.msra.mxu1 %v647_v35  ;;  %v1139_v16 = vsub.f32 %v2012_v8, %v1138_v12 }
  0x35   :  { %1630 = vmatpush3.msra.mxu0 %v1916_v27  ;;  %1640 = vmatprep.subr.mxu1 %v1805_v0 }
  0x36   :  { %1645 = vmatprep.subr.mxu0 %v1805_v0  ;;  %1641 = vmatpush3.msra.mxu1 %v654_v37  ;;  %v1140_v19 = vand.u32 4294901760, %v1139_v16 }
  0x37   :  { %1656 = vmatprep.subr.mxu1 %v1805_v0 }
  0xe5   :  { %v211_v40 = vpop.f32.mrf.mxu1 }
  0xe6   :  { %v135_v39 = vpop.f32.mrf.mxu0 }
  0xe7   :  { %v136_v41 = vadd.f32 %v1518_v38, %v135_v39  ;;  %v1602_v43 = vpop.f32.mrf.mxu1 }
  0xe8   :  { %v1597_v42 = vpop.f32.mrf.mxu0 }
  0xe9   :  { %v212_v44 = vadd.f32 %v211_v40, %v136_v41  ;;  %v359_v46 = vpop.f32.mrf.mxu1 }
  0xea   :  { %v285_v45 = vpop.f32.mrf.mxu0 }
  0xeb   :  { %v286_v47 = vadd.f32 %v285_v45, %v212_v44  ;;  %v1612_v49 = vpop.f32.mrf.mxu1 }
  0xec   :  { %v1607_v48 = vpop.f32.mrf.mxu0 }
  0xed   :  { %v360_v50 = vadd.f32 %v359_v46, %v286_v47  ;;  %v505_v52 = vpop.f32.mrf.mxu1 }
  0xee   :  { %v433_v51 = vpop.f32.mrf.mxu0 }
  0xef   :  { %v434_v53 = vadd.f32 %v433_v51, %v360_v50  ;;  %v1622_v55 = vpop.f32.mrf.mxu1 }
  0xf0   :  { %v1617_v54 = vpop.f32.mrf.mxu0 }
  0xf1   :  { %v506_v56 = vadd.f32 %v505_v52, %v434_v53 }
  0xf3   :  { %v509_v57 = vmax.f32 %v506_v56, 0.0 }
  0xf5   :  { %v523_v58 = vsel %vm521_vm2, %v509_v57, 0  ;;  %v1520_v57 = vld [vmem:[#allocation4] ss:$0 sm:$0xff] }
  0xf6   :  { %v594_v59 = vand.u32 4294901760, %v523_v58 }
  0xf8   :  { %v595_v60 = vsub.f32 %v523_v58, %v594_v59  ;;  %1643 = vmatmul.mubr.f32.vlgmr.msra.gmra.mxu1 %v594_v59 }
  0xf9   :  { %1657 = vmatpush3.msra.mxu1 %v1883_v15  ;;  %1664 = vmatprep.mubr.msk.f32.mxu1 %vm1806_vm0, %v1805_v0 }
  0xfa   :  { %1658 = vmatprep.subr.mxu1 %v1805_v0  ;;  %v596_v61 = vand.u32 4294901760, %v595_v60 }
  0xfb   :  { %1659 = vmatpush3.msra.mxu1 %v1891_v18 }
  0xfc   :  { %1660 = vmatprep.subr.mxu1 %v1805_v0  ;;  %v597_v62 = vsub.f32 %v595_v60, %v596_v61 }
  0xfd   :  { %1661 = vmatpush3.msra.mxu1 %v1902_v22 }
  0xfe   :  { %1662 = vmatprep.subr.mxu1 %v1805_v0  ;;  %v598_v63 = vand.u32 4294901760, %v597_v62 }
  0xff   :  { %1663 = vmatpush3.msra.mxu1 %v1916_v27 }
 0x100   :  { %1665 = vmatmul.mubr.f32.vlgmr.msra.gmra.mxu1 %v596_v61  ;;  %1678 = vmatprep.subr.mxu1 %v1805_v0 }
 0x101   :  { %1632 = vmatmul.mubr.f32.vlgmr.msra.gmra.mxu0 %v598_v63  ;;  %1679 = vmatpush3.msra.mxu1 %v1883_v15  ;;  %v1133_v15 = vand.u32 4294901760, %v1132_v11 }
 0x102   :  { %1646 = vmatpush3.msra.mxu0 %v1889_v17  ;;  %1680 = vmatprep.subr.mxu1 %v1805_v0  ;;  %v1145_v17 = vand.u32 4294901760, %v2026_v13 }
 0x103   :  { %1647 = vmatprep.subr.mxu0 %v1805_v0  ;;  %1681 = vmatpush3.msra.mxu1 %v1891_v18  ;;  %v2037_v18 = vsub.f32 %v1011_v10, %v2028_v14 }
 0x104   :  { %1648 = vmatpush3.msra.mxu0 %v1900_v21  ;;  %1682 = vmatprep.subr.mxu1 %v1805_v0 }
 0x105   :  { %1649 = vmatprep.subr.mxu0 %v1805_v0  ;;  %1683 = vmatpush3.msra.mxu1 %v1902_v22  ;;  %v1152_v21 = vand.u32 4294901760, %v2037_v18 }
 0x106   :  { %1650 = vmatpush3.msra.mxu0 %v1914_v26  ;;  %1684 = vmatprep.subr.mxu1 %v1805_v0 }
 0x107   :  { %1651 = vmatprep.subr.mxu0 %v1805_v0  ;;  %1653 = vmatprep.mubr.msk.f32.mxu0 %vm1806_vm0, %v1805_v0  ;;  %v1153_v23 = vsub.f32 %v2037_v18, %v1152_v21 }
 0x108   :  { %1652 = vmatpush3.msra.mxu0 %v1925_v31  ;;  %1685 = vmatpush3.msra.mxu1 %v1916_v27  ;;  %v1519_v31 = vld [vmem:[%s2105_s4] ss:$0 sm:$0xff] }
 0x109   :  { %1686 = vmatprep.mubr.msk.f32.mxu1 %vm1806_vm0, %v1805_v0  ;;  %1654 = vmatmul.mubr.f32.vlgmr.msra.gmra.mxu0 %v595_v60  ;;  %v1154_v24 = vand.u32 4294901760, %v1153_v23 }
 0x10a   :  { %1667 = vmatprep.subr.mxu0 %v1805_v0  ;;  %1687 = vmatmul.mubr.f32.vlgmr.msra.gmra.mxu1 %v594_v59 }
 0x10b   :  { %1668 = vmatpush3.msra.mxu0 %v631_v20  ;;  %1675 = vmatprep.mubr.msk.f32.mxu0 %vm1806_vm0, %v1805_v0  ;;  %v1146_v20 = vsub.f32 %v2026_v13, %v1145_v17 }
 0x10c   :  { %1669 = vmatprep.subr.mxu0 %v1805_v0  ;;  %1700 = vmatprep.subr.mxu1 %v1805_v0 }
 0x10d   :  { %1670 = vmatpush3.msra.mxu0 %v638_v25  ;;  %1708 = vmatprep.mubr.msk.f32.mxu1 %vm1806_vm0, %v1805_v0  ;;  %v1147_v22 = vand.u32 4294901760, %v1146_v20 }
 0x10e   :  { %1671 = vmatprep.subr.mxu0 %v1805_v0  ;;  %1701 = vmatpush3.msra.mxu1 %v1133_v15 }
 0x10f   :  { %1672 = vmatpush3.msra.mxu0 %v645_v30  ;;  %1702 = vmatprep.subr.mxu1 %v1805_v0 }
 0x110   :  { %1673 = vmatprep.subr.mxu0 %v1805_v0  ;;  %1703 = vmatpush3.msra.mxu1 %v1140_v19 }
 0x111   :  { %1674 = vmatpush3.msra.mxu0 %v652_v34  ;;  %1704 = vmatprep.subr.mxu1 %v1805_v0 }
 0x112   :  { %1676 = vmatmul.mubr.f32.vlgmr.msra.gmra.mxu0 %v594_v59  ;;  %1689 = vmatprep.subr.mxu0 %v1805_v0 }
 0x113   :  { %1697 = vmatprep.mubr.msk.f32.mxu0 %vm1806_vm0, %v1805_v0  ;;  %1690 = vmatpush3.msra.mxu0 %v1995_v2 }
 0x114   :  { %1691 = vmatprep.subr.mxu0 %v1805_v0  ;;  %1705 = vmatpush3.msra.mxu1 %v1147_v22 }
 0x115   :  { %1692 = vmatpush3.msra.mxu0 %v2003_v5  ;;  %1706 = vmatprep.subr.mxu1 %v1805_v0 }
 0x116   :  { %1693 = vmatprep.subr.mxu0 %v1805_v0  ;;  %1707 = vmatpush3.msra.mxu1 %v1154_v24 }
 0x117   :  { %1694 = vmatpush3.msra.mxu0 %v2014_v9  ;;  %1722 = vmatprep.subr.mxu1 %v1805_v0 }
 0x118   :  { %1695 = vmatprep.subr.mxu0 %v1805_v0 }
 0x119   :  { %1696 = vmatpush3.msra.mxu0 %v2028_v14 }
 0x11a   :  { %1711 = vmatprep.subr.mxu0 %v1805_v0 }
 0x1b8   :  { %v691_v25 = vpop.f32.mrf.mxu1 }
 0x1ba   :  { %v1644_v26 = vpop.f32.mrf.mxu1 }
 0x1c0   :  { %v848_v27 = vpop.f32.mrf.mxu1 }
 0x1c1   :  { %v600_v28 = vpop.f32.mrf.mxu0 }
 0x1c2   :  { %v1666_v29 = vpop.f32.mrf.mxu1  ;;  %v601_v32 = vadd.f32 %v1519_v31, %v600_v28 }
 0x1c3   :  { %v1633_v30 = vpop.f32.mrf.mxu0 }
 0x1c4   :  { %v692_v35 = vadd.f32 %v691_v25, %v601_v32 }
 0x1c9   :  { %v771_v33 = vpop.f32.mrf.mxu0 }
 0x1ca   :  { %v1006_v34 = vpop.f32.mrf.mxu1  ;;  %v772_v38 = vadd.f32 %v771_v33, %v692_v35 }
 0x1cb   :  { %v1655_v36 = vpop.f32.mrf.mxu0 }
 0x1cc   :  { %v1688_v37 = vpop.f32.mrf.mxu1  ;;  %v849_v39 = vadd.f32 %v848_v27, %v772_v38 }
 0x1d2   :  { %v931_v40 = vpop.f32.mrf.mxu0 }
 0x1d3   :  { %v932_v41 = vadd.f32 %v931_v40, %v849_v39 }
 0x1d4   :  { %v1677_v42 = vpop.f32.mrf.mxu0 }
 0x1d5   :  { %v1007_v43 = vadd.f32 %v1006_v34, %v932_v41 }
 0x1d7   :  { %v1010_v44 = vmax.f32 %v1007_v43, 0.0 }
 0x1d9   :  { %v1023_v45 = vsel %vm521_vm2, %v1010_v44, 0 }
 0x1da   :  { %v1094_v46 = vand.u32 4294901760, %v1023_v45 }
 0x1dc   :  { %v1095_v47 = vsub.f32 %v1023_v45, %v1094_v46  ;;  %1709 = vmatmul.mubr.f32.vlgmr.msra.gmra.mxu1 %v1094_v46 }
 0x1dd   :  { %1723 = vmatpush3.msra.mxu1 %v1995_v2  ;;  %1730 = vmatprep.mubr.msk.f32.mxu1 %vm1806_vm0, %v1805_v0 }
 0x1de   :  { %1724 = vmatprep.subr.mxu1 %v1805_v0  ;;  %v1096_v48 = vand.u32 4294901760, %v1095_v47 }
 0x1df   :  { %1725 = vmatpush3.msra.mxu1 %v2003_v5 }
 0x1e0   :  { %1726 = vmatprep.subr.mxu1 %v1805_v0  ;;  %v1097_v49 = vsub.f32 %v1095_v47, %v1096_v48 }
 0x1e1   :  { %1727 = vmatpush3.msra.mxu1 %v2014_v9 }
 0x1e2   :  { %1728 = vmatprep.subr.mxu1 %v1805_v0  ;;  %v1098_v50 = vand.u32 4294901760, %v1097_v49 }
 0x1e3   :  { %1729 = vmatpush3.msra.mxu1 %v2028_v14 }
 0x1e4   :  { %1731 = vmatmul.mubr.f32.vlgmr.msra.gmra.mxu1 %v1096_v48  ;;  %1744 = vmatprep.subr.mxu1 %v1805_v0 }
 0x1e5   :  { %1698 = vmatmul.mubr.f32.vlgmr.msra.gmra.mxu0 %v1098_v50  ;;  %1745 = vmatpush3.msra.mxu1 %v1995_v2 }
 0x1e6   :  { %1712 = vmatpush3.msra.mxu0 %v2001_v4  ;;  %1746 = vmatprep.subr.mxu1 %v1805_v0 }
 0x1e7   :  { %1713 = vmatprep.subr.mxu0 %v1805_v0  ;;  %1747 = vmatpush3.msra.mxu1 %v2003_v5 }
 0x1e8   :  { %1714 = vmatpush3.msra.mxu0 %v2012_v8  ;;  %1748 = vmatprep.subr.mxu1 %v1805_v0 }
 0x1e9   :  { %1715 = vmatprep.subr.mxu0 %v1805_v0  ;;  %1749 = vmatpush3.msra.mxu1 %v2014_v9 }
 0x1ea   :  { %1716 = vmatpush3.msra.mxu0 %v2026_v13  ;;  %1750 = vmatprep.subr.mxu1 %v1805_v0 }
 0x1eb   :  { %1717 = vmatprep.subr.mxu0 %v1805_v0  ;;  %1719 = vmatprep.mubr.msk.f32.mxu0 %vm1806_vm0, %v1805_v0 }
 0x1ec   :  { %1718 = vmatpush3.msra.mxu0 %v2037_v18  ;;  %1751 = vmatpush3.msra.mxu1 %v2028_v14 }
 0x1ed   :  { %1752 = vmatprep.mubr.msk.f32.mxu1 %vm1806_vm0, %v1805_v0  ;;  %1720 = vmatmul.mubr.f32.vlgmr.msra.gmra.mxu0 %v1095_v47 }
 0x1ee   :  { %1733 = vmatprep.subr.mxu0 %v1805_v0  ;;  %1753 = vmatmul.mubr.f32.vlgmr.msra.gmra.mxu1 %v1094_v46 }
 0x1ef   :  { %1734 = vmatpush3.msra.mxu0 %v1131_v7  ;;  %1741 = vmatprep.mubr.msk.f32.mxu0 %vm1806_vm0, %v1805_v0 }
 0x1f0   :  { %1735 = vmatprep.subr.mxu0 %v1805_v0 }
 0x1f1   :  { %1736 = vmatpush3.msra.mxu0 %v1138_v12 }
 0x1f2   :  { %1737 = vmatprep.subr.mxu0 %v1805_v0 }
 0x1f3   :  { %1738 = vmatpush3.msra.mxu0 %v1145_v17 }
 0x1f4   :  { %1739 = vmatprep.subr.mxu0 %v1805_v0 }
 0x1f5   :  { %1740 = vmatpush3.msra.mxu0 %v1152_v21 }
 0x1f6   :  { %1742 = vmatmul.mubr.f32.vlgmr.msra.gmra.mxu0 %v1094_v46 }
 0x29c   :  { %v1191_v51 = vpop.f32.mrf.mxu1 }
 0x29e   :  { %v1710_v52 = vpop.f32.mrf.mxu1 }
 0x2a4   :  { %v1348_v53 = vpop.f32.mrf.mxu1 }
 0x2a5   :  { %v1100_v54 = vpop.f32.mrf.mxu0 }
 0x2a6   :  { %v1732_v55 = vpop.f32.mrf.mxu1  ;;  %v1101_v58 = vadd.f32 %v1520_v57, %v1100_v54 }
 0x2a7   :  { %v1699_v56 = vpop.f32.mrf.mxu0 }
 0x2a8   :  { %v1192_v61 = vadd.f32 %v1191_v51, %v1101_v58 }
 0x2ad   :  { %v1271_v59 = vpop.f32.mrf.mxu0 }
 0x2ae   :  { %v1506_v60 = vpop.f32.mrf.mxu1  ;;  %v1272_v1 = vadd.f32 %v1271_v59, %v1192_v61 }
 0x2af   :  { %v1721_v62 = vpop.f32.mrf.mxu0 }
 0x2b0   :  { %v1754_v63 = vpop.f32.mrf.mxu1  ;;  %v1349_v2 = vadd.f32 %v1348_v53, %v1272_v1 }
 0x2b6   :  { %v1431_v0 = vpop.f32.mrf.mxu0 }
 0x2b7   :  { %v1432_v3 = vadd.f32 %v1431_v0, %v1349_v2 }
 0x2b8   :  { %v1743_v4 = vpop.f32.mrf.mxu0 }
 0x2b9   :  { %v1507_v5 = vadd.f32 %v1506_v60, %v1432_v3 }
 0x2bb   :  { %1511 = vst.msk [vmem:[%s2108_s7] sm:$0xff] %vm1510_vm3, %v1507_v5 }
 0x2bc   :  { %1516 = vsyncpa [#allocation3], 1 }
 0x2bd   :  { %1517 = vsyncpa [#allocation5], 1 }

</bundles_post_ra>
